<compile_context>
chip_gen: v6e
topology: v6e:2x2x1
jax: 0.10.0
libtpu: 0.0.40
codegen_flags: <defaults>
</compile_context>

<pallas_src>
import jax
import jax.numpy as jnp
from jax.experimental import pallas as pl
from jax.experimental.pallas import tpu as pltpu

EPS = 1e-12  # matches torch.nn.functional.normalize default eps


def dxml_kernel(x_ref, w1_ref, b1_ref, w2_ref, b2_ref, o_ref):
    # One batch tile.  Normalization / bias math in f32; matmuls in the storage
    # dtype of the weights (bf16 on v6e/v7x) with f32 accumulation on the MXU.
    x = x_ref[...].astype(jnp.float32)

    # ---- F.normalize(input, dim=1, p=2) ----
    # x / max(||x||, eps) == x * rsqrt(max(||x||^2, eps^2))  (rsqrt -> EUP slot)
    inv_n = jax.lax.rsqrt(
        jnp.maximum(jnp.sum(x * x, axis=1, keepdims=True), EPS * EPS))
    xn = x * inv_n

    # ---- W1 (Linear) + ReLU ----
    h = jnp.dot(xn.astype(w1_ref.dtype), w1_ref[...],
                preferred_element_type=jnp.float32)
    h = jnp.maximum(h + b1_ref[...].astype(jnp.float32), 0.0)

    # ---- W2 (Linear) ----
    y = jnp.dot(h.astype(w2_ref.dtype), w2_ref[...],
                preferred_element_type=jnp.float32)
    y = y + b2_ref[...].astype(jnp.float32)

    # ---- dropout: eval-mode identity ----
    # TODO(synk): training-mode dropout (pltpu.prng_seed + prng_random_bits
    # masking) not emitted; forward here is eval semantics.

    # ---- F.normalize(output, dim=1, p=2) ----
    inv_n2 = jax.lax.rsqrt(
        jnp.maximum(jnp.sum(y * y, axis=1, keepdims=True), EPS * EPS))
    o_ref[...] = (y * inv_n2).astype(o_ref.dtype)


def _round_up(n, m):
    return ((n + m - 1) // m) * m


def _tensorcores_per_chip():
    """2 on v7x (megacore sharding of the batch grid axis), 1 elsewhere."""
    try:
        kind = jax.devices()[0].device_kind.lower()
    except Exception:
        return 1
    return 2 if ("v7" in kind or "7x" in kind) else 1


def _choose_tiling(B, cap, align, n_cores):
    """Pick (batch_tile, padded_batch).

    - batch_tile is a multiple of `align` (sublane packing: 8 f32 / 16 bf16 /
      32 int8-fp8) and <= cap.
    - Single-TC chips (v5e/v6e): fewest grid steps possible (one step when the
      whole batch fits under the cap) -- per-step overhead (~0.35 us) dominates
      at these tiny per-step costs.
    - v7x (2 TCs): force an even number of >= 2 steps so both TensorCores get
      equal work when the grid axis is "parallel".
    """
    cap = max(align, (cap // align) * align)
    if n_cores > 1 and B > align:
        steps = max(2, -(-B // cap))     # ceil(B / cap), at least 2
        steps += steps % 2               # even step count -> balanced cores
    else:
        steps = max(1, -(-B // cap))
    bt = _round_up(-(-B // steps), align)
    bt = min(bt, cap)
    Bp = _round_up(B, bt)
    return bt, Bp


def dxml_forward(x, w1, b1, w2, b2, *, batch_tile=2048):
    B, D = x.shape
    d_in, H = w1.shape
    h_in, E = w2.shape
    assert d_in == D and h_in == H
    b1 = jnp.reshape(b1, (1, H))
    b2 = jnp.reshape(b2, (1, E))

    # Zero-pad only the hidden dim to a multiple of 128 (lane-dense h).  Padded
    # W1 columns / b1 entries / W2 rows are zero -> padded h columns are
    # ReLU(0)=0 -> contribute nothing to y.  Numerics unchanged.
    Hp = _round_up(H, 128)
    if Hp != H:
        w1 = jnp.pad(w1, ((0, 0), (0, Hp - H)))
        b1 = jnp.pad(b1, ((0, 0), (0, Hp - H)))
        w2 = jnp.pad(w2, ((0, Hp - H), (0, 0)))

    # NOTE: D and E are deliberately NOT padded to 128.  The kernel is
    # HBM-streaming bound; padding D would multiply the dominant x stream and
    # padding E would multiply the output stream (plus force an extra slice
    # pass).  The masked <128-lane VPU/store work is hidden under DMA.

    itemsize = jnp.dtype(x.dtype).itemsize
    align = {4: 8, 2: 16, 1: 32}.get(itemsize, 8)   # sublane packing alignment
    bt, Bp = _choose_tiling(B, batch_tile, align, _tensorcores_per_chip())
    if Bp != B:
        x = jnp.pad(x, ((0, Bp - B), (0, 0)))       # zero rows; sliced off below
    assert Bp % bt == 0 and bt % align == 0
    grid = (Bp // bt,)

    bytes_weights = (w1.size * jnp.dtype(w1.dtype).itemsize
                     + b1.size * jnp.dtype(b1.dtype).itemsize
                     + w2.size * jnp.dtype(w2.dtype).itemsize
                     + b2.size * jnp.dtype(b2.dtype).itemsize)
    cost = pl.CostEstimate(
        flops=2 * Bp * (D * Hp + Hp * E),
        transcendentals=2 * Bp,                      # two rsqrt per row
        bytes_accessed=Bp * D * itemsize + bytes_weights + Bp * E * itemsize,
    )

    y = pl.pallas_call(
        dxml_kernel,
        out_shape=jax.ShapeDtypeStruct((Bp, E), x.dtype),
        grid_spec=pltpu.PrefetchScalarGridSpec(
            num_scalar_prefetch=0,
            grid=grid,
            in_specs=[
                pl.BlockSpec((bt, D), lambda i: (i, 0)),    # x tile (streamed)
                pl.BlockSpec((D, Hp), lambda i: (0, 0)),    # W1 (VMEM-resident)
                pl.BlockSpec((1, Hp), lambda i: (0, 0)),    # b1 (resident)
                pl.BlockSpec((Hp, E), lambda i: (0, 0)),    # W2 (resident)
                pl.BlockSpec((1, E), lambda i: (0, 0)),     # b2 (resident)
            ],
            out_specs=pl.BlockSpec((bt, E), lambda i: (i, 0)),  # unpadded E
        ),
        compiler_params=pltpu.CompilerParams(
            dimension_semantics=("parallel",),  # rows independent -> megacore
        ),
        cost_estimate=cost,
    )(x, w1, b1, w2, b2)

    if Bp != B:
        y = y[:B]
    return y


def dxml_reference(x, w1, b1, w2, b2):
    xf = x.astype(jnp.float32)
    xf = xf / jnp.maximum(jnp.linalg.norm(xf, axis=1, keepdims=True), EPS)
    h = jnp.maximum(xf @ w1.astype(jnp.float32)
                    + b1.astype(jnp.float32).reshape(1, -1), 0.0)
    y = h @ w2.astype(jnp.float32) + b2.astype(jnp.float32).reshape(1, -1)
    y = y / jnp.maximum(jnp.linalg.norm(y, axis=1, keepdims=True), EPS)
    return y


if __name__ == "__main__":
    # Shapes consistent with the module (kept small):
    #   x_dimension=32, mid_embedding_size=64, resultant_embedding_size=32
    B, D, H, E = 256, 32, 64, 32

    key = jax.random.PRNGKey(0)
    kx, kw1, kb1, kw2, kb2 = jax.random.split(key, 5)

    x = jax.random.normal(kx, (B, D), dtype=jnp.float32)
    # Deterministic parameter init (Kaiming-uniform-ish scale, like nn.Linear).
    w1 = jax.random.uniform(kw1, (D, H), jnp.float32, -1.0, 1.0) / jnp.sqrt(D)
    b1 = jax.random.uniform(kb1, (H,), jnp.float32, -1.0, 1.0) / jnp.sqrt(D)
    w2 = jax.random.uniform(kw2, (H, E), jnp.float32, -1.0, 1.0) / jnp.sqrt(H)
    b2 = jax.random.uniform(kb2, (E,), jnp.float32, -1.0, 1.0) / jnp.sqrt(H)

    ref = dxml_reference(x, w1, b1, w2, b2)

    # f32 storage path (validation-grade, matches PyTorch numerics closely).
    out = jax.block_until_ready(dxml_forward(x, w1, b1, w2, b2))
    assert out.shape == (B, E), out.shape
    assert jnp.allclose(out.astype(jnp.float32), ref, atol=1e-5, rtol=1e-5), \
        "f32 kernel mismatch vs reference"

    # bf16 storage path (recommended on v6e/v7x): halves the streamed HBM
    # bytes for x and y; MXU-native bf16 matmuls with f32 accumulation.
    out_bf16 = jax.block_until_ready(
        dxml_forward(x.astype(jnp.bfloat16),
                     w1.astype(jnp.bfloat16), b1.astype(jnp.bfloat16),
                     w2.astype(jnp.bfloat16), b2.astype(jnp.bfloat16)))
    assert out_bf16.shape == (B, E), out_bf16.shape
    assert jnp.allclose(out_bf16.astype(jnp.float32), ref, atol=5e-2, rtol=5e-2), \
        "bf16 kernel mismatch vs reference (loose tolerance)"

    # Ragged-batch path (B not a multiple of the sublane alignment): wrapper
    # pads rows and slices them back off.
    xr = x[:B - 3]
    out_r = jax.block_until_ready(dxml_forward(xr, w1, b1, w2, b2))
    assert out_r.shape == (B - 3, E), out_r.shape
    assert jnp.allclose(out_r.astype(jnp.float32), ref[:B - 3],
                        atol=1e-5, rtol=1e-5), "ragged-batch kernel mismatch"

    print("KERNEL_OK")
</pallas_src>

<mosaic_0001>
module attributes {stable_mosaic.version = 11 : i64} {
  func.func @dxml_kernel(%arg0: i32, %arg1: memref<256x32xf32, #tpu.memory_space<vmem>>, %arg2: memref<32x128xf32, #tpu.memory_space<vmem>>, %arg3: memref<1x128xf32, #tpu.memory_space<vmem>>, %arg4: memref<128x32xf32, #tpu.memory_space<vmem>>, %arg5: memref<1x32xf32, #tpu.memory_space<vmem>>, %arg6: memref<256x32xf32, #tpu.memory_space<vmem>>) attributes {dimension_semantics = [#tpu.dimension_semantics<parallel>], iteration_bounds = array<i64: 1>, scalar_prefetch = 0 : i64, scratch_operands = 0 : i64, tpu.core_type = #tpu.core_type<tc>, window_params = [{transform_indices = @transform_0, window_bounds = array<i64: 256, 32>}, {pipeline_mode = #tpu.pipeline_mode<synchronous>, transform_indices = @transform_1, window_bounds = array<i64: 32, 128>}, {pipeline_mode = #tpu.pipeline_mode<synchronous>, transform_indices = @transform_2, window_bounds = array<i64: 1, 128>}, {pipeline_mode = #tpu.pipeline_mode<synchronous>, transform_indices = @transform_3, window_bounds = array<i64: 128, 32>}, {pipeline_mode = #tpu.pipeline_mode<synchronous>, transform_indices = @transform_4, window_bounds = array<i64: 1, 32>}, {transform_indices = @transform_5, window_bounds = array<i64: 256, 32>}]} {
    %c0 = arith.constant 0 : index
    %c0_0 = arith.constant 0 : index
    %0 = vector.load %arg1[%c0, %c0_0] : memref<256x32xf32, #tpu.memory_space<vmem>>, vector<256x32xf32>
    %1 = arith.mulf %0, %0 : vector<256x32xf32>
    %cst = arith.constant dense<0.000000e+00> : vector<256xf32>
    %2 = vector.multi_reduction <add>, %1, %cst [1] : vector<256x32xf32> to vector<256xf32>
    %3 = vector.shape_cast %2 : vector<256xf32> to vector<256x1xf32>
    %cst_1 = arith.constant 1.000000e-24 : f32
    %4 = vector.broadcast %cst_1 : f32 to vector<256x1xf32>
    %5 = arith.maximumf %3, %4 : vector<256x1xf32>
    %6 = math.rsqrt %5 : vector<256x1xf32>
    %7 = vector.broadcast %6 : vector<256x1xf32> to vector<256x32xf32>
    %8 = arith.mulf %0, %7 : vector<256x32xf32>
    %c0_2 = arith.constant 0 : index
    %c0_3 = arith.constant 0 : index
    %9 = vector.load %arg2[%c0_2, %c0_3] : memref<32x128xf32, #tpu.memory_space<vmem>>, vector<32x128xf32>
    %cst_4 = arith.constant dense<0.000000e+00> : vector<256x128xf32>
    %10 = tpu.matmul %8, %9, %cst_4 {dimension_numbers = #tpu.dot_dimension_numbers<[1], [0], [0], [1], [0, 0, 1, 1], [], []>} : vector<256x32xf32>, vector<32x128xf32>, vector<256x128xf32> -> vector<256x128xf32>
    %c0_5 = arith.constant 0 : index
    %c0_6 = arith.constant 0 : index
    %11 = vector.load %arg3[%c0_5, %c0_6] : memref<1x128xf32, #tpu.memory_space<vmem>>, vector<1x128xf32>
    %12 = vector.broadcast %11 : vector<1x128xf32> to vector<256x128xf32>
    %13 = arith.addf %10, %12 : vector<256x128xf32>
    %cst_7 = arith.constant 0.000000e+00 : f32
    %14 = vector.broadcast %cst_7 : f32 to vector<256x128xf32>
    %15 = arith.maximumf %13, %14 : vector<256x128xf32>
    %c0_8 = arith.constant 0 : index
    %c0_9 = arith.constant 0 : index
    %16 = vector.load %arg4[%c0_8, %c0_9] : memref<128x32xf32, #tpu.memory_space<vmem>>, vector<128x32xf32>
    %cst_10 = arith.constant dense<0.000000e+00> : vector<256x32xf32>
    %17 = tpu.matmul %15, %16, %cst_10 {dimension_numbers = #tpu.dot_dimension_numbers<[1], [0], [0], [1], [0, 0, 1, 1], [], []>} : vector<256x128xf32>, vector<128x32xf32>, vector<256x32xf32> -> vector<256x32xf32>
    %c0_11 = arith.constant 0 : index
    %c0_12 = arith.constant 0 : index
    %18 = vector.load %arg5[%c0_11, %c0_12] : memref<1x32xf32, #tpu.memory_space<vmem>>, vector<1x32xf32>
    %19 = vector.broadcast %18 : vector<1x32xf32> to vector<256x32xf32>
    %20 = arith.addf %17, %19 : vector<256x32xf32>
    %21 = arith.mulf %20, %20 : vector<256x32xf32>
    %cst_13 = arith.constant dense<0.000000e+00> : vector<256xf32>
    %22 = vector.multi_reduction <add>, %21, %cst_13 [1] : vector<256x32xf32> to vector<256xf32>
    %23 = vector.shape_cast %22 : vector<256xf32> to vector<256x1xf32>
    %cst_14 = arith.constant 1.000000e-24 : f32
    %24 = vector.broadcast %cst_14 : f32 to vector<256x1xf32>
    %25 = arith.maximumf %23, %24 : vector<256x1xf32>
    %26 = math.rsqrt %25 : vector<256x1xf32>
    %27 = vector.broadcast %26 : vector<256x1xf32> to vector<256x32xf32>
    %28 = arith.mulf %20, %27 : vector<256x32xf32>
    %c0_15 = arith.constant 0 : index
    %c0_16 = arith.constant 0 : index
    %29 = vector.load %arg6[%c0_15, %c0_16] : memref<256x32xf32, #tpu.memory_space<vmem>>, vector<256x32xf32>
    tpu.vector_store %arg6[%c0_15, %c0_16], %28 {strides = array<i32>} : memref<256x32xf32, #tpu.memory_space<vmem>>, vector<256x32xf32>,
    return
  }
  func.func @transform_0(%arg0: i32) -> (i32, i32) {
    %c0_i32 = arith.constant 0 : i32
    %c0_i32_0 = arith.constant 0 : i32
    return %arg0, %c0_i32 : i32, i32
  }
  func.func @transform_1(%arg0: i32) -> (i32, i32) {
    %c0_i32 = arith.constant 0 : i32
    %c0_i32_0 = arith.constant 0 : i32
    %c0_i32_1 = arith.constant 0 : i32
    return %c0_i32, %c0_i32_0 : i32, i32
  }
  func.func @transform_2(%arg0: i32) -> (i32, i32) {
    %c0_i32 = arith.constant 0 : i32
    %c0_i32_0 = arith.constant 0 : i32
    %c0_i32_1 = arith.constant 0 : i32
    return %c0_i32, %c0_i32_0 : i32, i32
  }
  func.func @transform_3(%arg0: i32) -> (i32, i32) {
    %c0_i32 = arith.constant 0 : i32
    %c0_i32_0 = arith.constant 0 : i32
    %c0_i32_1 = arith.constant 0 : i32
    return %c0_i32, %c0_i32_0 : i32, i32
  }
  func.func @transform_4(%arg0: i32) -> (i32, i32) {
    %c0_i32 = arith.constant 0 : i32
    %c0_i32_0 = arith.constant 0 : i32
    %c0_i32_1 = arith.constant 0 : i32
    return %c0_i32, %c0_i32_0 : i32, i32
  }
  func.func @transform_5(%arg0: i32) -> (i32, i32) {
    %c0_i32 = arith.constant 0 : i32
    %c0_i32_0 = arith.constant 0 : i32
    return %arg0, %c0_i32 : i32, i32
  }
}

</mosaic_0001>

<bundles_post_ra>
// kernel: tpu_custom_call.1
= control target key start
LH: loop header
LB: loop body
LE: loop exit
PB: predicated region body
PF: predicated region fallthrough
CT: control target
= control target key end

     0   :  { %vm84_vm0 = vcmask 261120   ;;  %s2457_s0 = inlined_call_operand.vmem [shape: f32[256,32], index: 0, kind: input, shape index: {}]   ;;  %s2458_s1 = inlined_call_operand.vmem [shape: f32[32,128], index: 1, kind: input, shape index: {}]   ;;  %s2459_s3 = inlined_call_operand.vmem [shape: f32[128,32], index: 3, kind: input, shape index: {}]   ;;  %s2460_s2 = inlined_call_operand.vmem [shape: f32[1,128], index: 2, kind: input, shape index: {}]   ;;  %s2461_s4 = inlined_call_operand.vmem [shape: f32[1,32], index: 4, kind: input, shape index: {}]   ;;  %s2462_s5 = inlined_call_operand.vmem [shape: f32[256,32], index: 5, kind: output, shape index: {}]  }
   0x1   :  { %v1596_v0 = vld [vmem:[%s2457_s0] sm:$0xff]  ;;  %v1601_v1 = vld [vmem:[%s2457_s0 + $0x10] sm:$0xff]  ;;  %v1606_v2 = vld [vmem:[%s2457_s0 + $0x8] sm:$0xff] }
   0x2   :  { %v52_v3 = vmul.f32 %v1596_v0, %v1596_v0  ;;  %v54_v4 = vmul.f32 %v1601_v1, %v1601_v1  ;;  %v53_v5 = vmul.f32 %v1606_v2, %v1606_v2  ;;  %v1617_v6 = vld [vmem:[%s2457_s0 + $0x18] sm:$0xff]  ;;  %v1624_v8 = vld [vmem:[%s2457_s0 + $0x20] sm:$0xff]  ;;  %v1629_v9 = vld [vmem:[%s2457_s0 + $0x28] sm:$0xff] }
   0x3   :  { %v55_v7 = vmul.f32 %v1617_v6, %v1617_v6  ;;  %v56_v14 = vmul.f32 %v1624_v8, %v1624_v8  ;;  %v57_v15 = vmul.f32 %v1629_v9, %v1629_v9  ;;  %v1642_v16 = vld [vmem:[%s2457_s0 + $0x30] sm:$0xff]  ;;  %v1647_v17 = vld [vmem:[%s2457_s0 + $0x38] sm:$0xff]  ;;  %v1658_v22 = vld [vmem:[%s2457_s0 + $0x40] sm:$0xff] }
   0x4   :  { %v85_v10 = vsel %vm84_vm0, %v52_v3, 0.0  ;;  %v91_v11 = vsel %vm84_vm0, %v54_v4, 0.0  ;;  %v88_v12 = vsel %vm84_vm0, %v53_v5, 0.0  ;;  %v58_v20 = vmul.f32 %v1642_v16, %v1642_v16  ;;  %v1663_v23 = vld [vmem:[%s2457_s0 + $0x48] sm:$0xff]  ;;  %v1674_v28 = vld [vmem:[%s2457_s0 + $0x50] sm:$0xff]  ;;  %v1679_v29 = vld [vmem:[%s2457_s0 + $0x58] sm:$0xff] }
   0x5   :  { %86 = vadd.xlane.f32.xlu0 %v85_v10  ;;  %92 = vadd.xlane.f32.xlu1 %v91_v11  ;;  %v94_v13 = vsel %vm84_vm0, %v55_v7, 0.0  ;;  %v97_v18 = vsel %vm84_vm0, %v56_v14, 0.0  ;;  %v100_v19 = vsel %vm84_vm0, %v57_v15, 0.0  ;;  %v59_v21 = vmul.f32 %v1647_v17, %v1647_v17  ;;  %v1690_v34 = vld [vmem:[%s2457_s0 + $0x60] sm:$0xff]  ;;  %v1695_v35 = vld [vmem:[%s2457_s0 + $0x68] sm:$0xff]  ;;  %v1706_v40 = vld [vmem:[%s2457_s0 + $0x70] sm:$0xff] }
   0x6   :  { %v103_v24 = vsel %vm84_vm0, %v58_v20, 0.0  ;;  %v60_v26 = vmul.f32 %v1658_v22, %v1658_v22  ;;  %v61_v27 = vmul.f32 %v1663_v23, %v1663_v23  ;;  %v62_v32 = vmul.f32 %v1674_v28, %v1674_v28  ;;  %v1711_v41 = vld [vmem:[%s2457_s0 + $0x78] sm:$0xff]  ;;  %v1722_v46 = vld [vmem:[%s2457_s0 + $0x80] sm:$0xff]  ;;  %v1727_v47 = vld [vmem:[%s2457_s0 + $0x88] sm:$0xff] }
   0x7   :  { %v106_v25 = vsel %vm84_vm0, %v59_v21, 0.0  ;;  %v63_v33 = vmul.f32 %v1679_v29, %v1679_v29  ;;  %v64_v38 = vmul.f32 %v1690_v34, %v1690_v34  ;;  %v65_v39 = vmul.f32 %v1695_v35, %v1695_v35  ;;  %v280_v48 = vld [vmem:[%s2458_s1 + $0x18] sm:$0xff]  ;;  %v279_v53 = vld [vmem:[%s2458_s1 + $0x10] sm:$0xff]  ;;  %v278_v56 = vld [vmem:[%s2458_s1 + $0x8] sm:$0xff] }
   0x8   :  { %v109_v30 = vsel %vm84_vm0, %v60_v26, 0.0  ;;  %v112_v31 = vsel %vm84_vm0, %v61_v27, 0.0  ;;  %v115_v36 = vsel %vm84_vm0, %v62_v32, 0.0  ;;  %v66_v44 = vmul.f32 %v1706_v40, %v1706_v40  ;;  %1267 = vmatprep.subr.mxu0 %v280_v48  ;;  %v1744_v54 = vld [vmem:[%s2457_s0 + $0x90] sm:$0xff]  ;;  %v1749_v55 = vld [vmem:[%s2457_s0 + $0x98] sm:$0xff]  ;;  %v277_v61 = vld [vmem:[%s2458_s1] sm:$0xff] }
   0x9   :  { %89 = vadd.xlane.f32.xlu0 %v88_v12  ;;  %95 = vadd.xlane.f32.xlu1 %v94_v13  ;;  %v118_v37 = vsel %vm84_vm0, %v63_v33, 0.0  ;;  %v121_v42 = vsel %vm84_vm0, %v64_v38, 0.0  ;;  %v124_v43 = vsel %vm84_vm0, %v65_v39, 0.0  ;;  %v67_v45 = vmul.f32 %v1711_v41, %v1711_v41  ;;  %v1766_v62 = vld [vmem:[%s2457_s0 + $0xa0] sm:$0xff]  ;;  %v1771_v63 = vld [vmem:[%s2457_s0 + $0xa8] sm:$0xff]  ;;  %v1782_v10 = vld [vmem:[%s2457_s0 + $0xb0] sm:$0xff] }
   0xa   :  { %v127_v49 = vsel %vm84_vm0, %v66_v44, 0.0  ;;  %v68_v51 = vmul.f32 %v1722_v46, %v1722_v46  ;;  %v69_v52 = vmul.f32 %v1727_v47, %v1727_v47  ;;  %1268 = vmatpush3.msra.mxu0 %v280_v48  ;;  %v70_v59 = vmul.f32 %v1744_v54, %v1744_v54  ;;  %v1787_v11 = vld [vmem:[%s2457_s0 + $0xb8] sm:$0xff]  ;;  %v1814_v26 = vld [vmem:[%s2457_s0 + $0xd0] sm:$0xff] }
   0xb   :  { %v130_v50 = vsel %vm84_vm0, %v67_v45, 0.0  ;;  %1269 = vmatprep.subr.mxu0 %v279_v53  ;;  %v71_v60 = vmul.f32 %v1749_v55, %v1749_v55  ;;  %v72_v5 = vmul.f32 %v1766_v62, %v1766_v62  ;;  %v73_v7 = vmul.f32 %v1771_v63, %v1771_v63  ;;  %v1819_v27 = vld [vmem:[%s2457_s0 + $0xd8] sm:$0xff]  ;;  %v1846_v44 = vld [vmem:[%s2457_s0 + $0xf0] sm:$0xff] }
   0xc   :  { %1270 = vmatpush3.msra.mxu0 %v279_v53  ;;  %v133_v57 = vsel %vm84_vm0, %v68_v51, 0.0  ;;  %v136_v58 = vsel %vm84_vm0, %v69_v52, 0.0  ;;  %v139_v3 = vsel %vm84_vm0, %v70_v59, 0.0  ;;  %v74_v14 = vmul.f32 %v1782_v10, %v1782_v10  ;;  %v1851_v45 = vld [vmem:[%s2457_s0 + $0xf8] sm:$0xff]  ;;  %v1885_v59 = vld [vmem:[%s2459_s3 + $0x60] sm:$0xff] }
   0xd   :  { %98 = vadd.xlane.f32.xlu0 %v97_v18  ;;  %101 = vadd.xlane.f32.xlu1 %v100_v19  ;;  %v142_v4 = vsel %vm84_vm0, %v71_v60, 0.0  ;;  %v145_v12 = vsel %vm84_vm0, %v72_v5, 0.0  ;;  %v148_v13 = vsel %vm84_vm0, %v73_v7, 0.0  ;;  %v75_v15 = vmul.f32 %v1787_v11, %v1787_v11  ;;  %v1798_v18 = vld [vmem:[%s2457_s0 + $0xc0] sm:$0xff]  ;;  %v1803_v19 = vld [vmem:[%s2457_s0 + $0xc8] sm:$0xff]  ;;  %v1892_v60 = vld [vmem:[%s2459_s3 + $0x58] sm:$0xff] }
   0xe   :  { %1271 = vmatprep.subr.mxu0 %v278_v56  ;;  %v151_v20 = vsel %vm84_vm0, %v74_v14, 0.0  ;;  %v78_v32 = vmul.f32 %v1814_v26, %v1814_v26  ;;  %v79_v33 = vmul.f32 %v1819_v27, %v1819_v27  ;;  %v83_v51 = vmul.f32 %v1851_v45, %v1851_v45  ;;  %v1920_v5 = vld [vmem:[%s2459_s3 + $0x38] sm:$0xff]  ;;  %v1927_v7 = vld [vmem:[%s2459_s3 + $0x30] sm:$0xff] }
   0xf   :  { %1272 = vmatpush3.msra.mxu0 %v278_v56  ;;  %v154_v21 = vsel %vm84_vm0, %v75_v15, 0.0  ;;  %v1864_v56 = vld [vmem:[%s2459_s3 + $0x78] sm:$0xff]  ;;  %v1955_v15 = vld [vmem:[%s2459_s3 + $0x10] sm:$0xff] }
  0x10   :  { %1273 = vmatprep.subr.mxu0 %v277_v61  ;;  %v163_v38 = vsel %vm84_vm0, %v78_v32, 0.0  ;;  %v166_v39 = vsel %vm84_vm0, %v79_v33, 0.0  ;;  %v178_v53 = vsel %vm84_vm0, %v83_v51, 0.0  ;;  %1403 = vmatprep.subr.mxu1 %v1864_v56  ;;  %v1948_v14 = vld [vmem:[%s2459_s3 + $0x18] sm:$0xff] }
  0x11   :  { %104 = vadd.xlane.f32.xlu0 %v103_v24  ;;  %107 = vadd.xlane.f32.xlu1 %v106_v25  ;;  %v76_v24 = vmul.f32 %v1798_v18, %v1798_v18  ;;  %v77_v25 = vmul.f32 %v1803_v19, %v1803_v19 }
  0x12   :  { %1274 = vmatpush3.msra.mxu0 %v277_v61  ;;  %1419 = vmatpush3.msra.mxu1 %v1864_v56  ;;  %v1899_v61 = vld [vmem:[%s2459_s3 + $0x50] sm:$0xff] }
  0x13   :  { %1323 = vmatprep.subr.mxu0 %v1864_v56 }
  0x15   :  { %110 = vadd.xlane.f32.xlu0 %v109_v30  ;;  %113 = vadd.xlane.f32.xlu1 %v112_v31  ;;  %v157_v30 = vsel %vm84_vm0, %v76_v24, 0.0  ;;  %v160_v31 = vsel %vm84_vm0, %v77_v25, 0.0 }
  0x19   :  { %116 = vadd.xlane.f32.xlu0 %v115_v36  ;;  %119 = vadd.xlane.f32.xlu1 %v118_v37  ;;  %v1830_v36 = vld [vmem:[%s2457_s0 + $0xe0] sm:$0xff]  ;;  %v1835_v37 = vld [vmem:[%s2457_s0 + $0xe8] sm:$0xff] }
  0x1d   :  { %122 = vadd.xlane.f32.xlu0 %v121_v42  ;;  %125 = vadd.xlane.f32.xlu1 %v124_v43  ;;  %v80_v42 = vmul.f32 %v1830_v36, %v1830_v36  ;;  %v81_v43 = vmul.f32 %v1835_v37, %v1835_v37 }
  0x1f   :  { %v169_v48 = vsel %vm84_vm0, %v80_v42, 0.0 }
  0x21   :  { %128 = vadd.xlane.f32.xlu0 %v127_v49  ;;  %131 = vadd.xlane.f32.xlu1 %v130_v50  ;;  %v172_v49 = vsel %vm84_vm0, %v81_v43, 0.0  ;;  %v82_v50 = vmul.f32 %v1846_v44, %v1846_v44 }
  0x23   :  { %v175_v52 = vsel %vm84_vm0, %v82_v50, 0.0 }
  0x25   :  { %134 = vadd.xlane.f32.xlu0 %v133_v57  ;;  %137 = vadd.xlane.f32.xlu1 %v136_v58  ;;  %v1871_v57 = vld [vmem:[%s2459_s3 + $0x70] sm:$0xff]  ;;  %v1878_v58 = vld [vmem:[%s2459_s3 + $0x68] sm:$0xff] }
  0x26   :  { %1404 = vmatprep.subr.mxu1 %v1871_v57 }
  0x27   :  { %1420 = vmatpush3.msra.mxu1 %v1871_v57 }
  0x28   :  { %1405 = vmatprep.subr.mxu1 %v1878_v58 }
  0x29   :  { %140 = vadd.xlane.f32.xlu0 %v139_v3  ;;  %143 = vadd.xlane.f32.xlu1 %v142_v4  ;;  %v1906_v3 = vld [vmem:[%s2459_s3 + $0x48] sm:$0xff]  ;;  %v1913_v4 = vld [vmem:[%s2459_s3 + $0x40] sm:$0xff] }
  0x2a   :  { %1421 = vmatpush3.msra.mxu1 %v1878_v58 }
  0x2b   :  { %1406 = vmatprep.subr.mxu1 %v1885_v59 }
  0x2c   :  { %1422 = vmatpush3.msra.mxu1 %v1885_v59 }
  0x2d   :  { %146 = vadd.xlane.f32.xlu0 %v145_v12  ;;  %149 = vadd.xlane.f32.xlu1 %v148_v13  ;;  %v1934_v12 = vld [vmem:[%s2459_s3 + $0x28] sm:$0xff]  ;;  %v1941_v13 = vld [vmem:[%s2459_s3 + $0x20] sm:$0xff] }
  0x2e   :  { %1407 = vmatprep.subr.mxu1 %v1892_v60 }
  0x2f   :  { %1423 = vmatpush3.msra.mxu1 %v1892_v60 }
  0x30   :  { %1408 = vmatprep.subr.mxu1 %v1899_v61 }
  0x31   :  { %152 = vadd.xlane.f32.xlu0 %v151_v20  ;;  %155 = vadd.xlane.f32.xlu1 %v154_v21  ;;  %v1962_v20 = vld [vmem:[%s2459_s3 + $0x8] sm:$0xff] }
  0x32   :  { %1424 = vmatpush3.msra.mxu1 %v1899_v61 }
  0x33   :  { %1409 = vmatprep.subr.mxu1 %v1906_v3 }
  0x34   :  { %1425 = vmatpush3.msra.mxu1 %v1906_v3 }
  0x35   :  { %158 = vadd.xlane.f32.xlu0 %v157_v30  ;;  %161 = vadd.xlane.f32.xlu1 %v160_v31 }
  0x36   :  { %1410 = vmatprep.subr.mxu1 %v1913_v4 }
  0x37   :  { %1426 = vmatpush3.msra.mxu1 %v1913_v4 }
  0x38   :  { %1411 = vmatprep.subr.mxu1 %v1920_v5 }
  0x39   :  { %164 = vadd.xlane.f32.xlu0 %v163_v38  ;;  %167 = vadd.xlane.f32.xlu1 %v166_v39 }
  0x3a   :  { %1427 = vmatpush3.msra.mxu1 %v1920_v5 }
  0x3b   :  { %1412 = vmatprep.subr.mxu1 %v1927_v7 }
  0x3c   :  { %1428 = vmatpush3.msra.mxu1 %v1927_v7 }
  0x3d   :  { %170 = vadd.xlane.f32.xlu0 %v169_v48  ;;  %173 = vadd.xlane.f32.xlu1 %v172_v49 }
  0x3e   :  { %1413 = vmatprep.subr.mxu1 %v1934_v12 }
  0x3f   :  { %1429 = vmatpush3.msra.mxu1 %v1934_v12 }
  0x40   :  { %1414 = vmatprep.subr.mxu1 %v1941_v13 }
  0x41   :  { %176 = vadd.xlane.f32.xlu0 %v175_v52  ;;  %179 = vadd.xlane.f32.xlu1 %v178_v53 }
  0x42   :  { %1430 = vmatpush3.msra.mxu1 %v1941_v13 }
  0x43   :  { %1415 = vmatprep.subr.mxu1 %v1948_v14 }
  0x44   :  { %1431 = vmatpush3.msra.mxu1 %v1948_v14 }
  0x45   :  { %1416 = vmatprep.subr.mxu1 %v1955_v15 }
  0x46   :  { %1432 = vmatpush3.msra.mxu1 %v1955_v15 }
  0x47   :  { %1417 = vmatprep.subr.mxu1 %v1962_v20 }
  0x48   :  { %1433 = vmatpush3.msra.mxu1 %v1962_v20 }
  0x8e   :  { %v87_v21 = vpop.xlane.xlu0 %86  ;;  %v93_v24 = vpop.xlane.xlu1 %92 }
  0x8f   :  { %v181_v25 = vmax.f32 %v87_v21, 1e-24  ;;  %v183_v30 = vmax.f32 %v93_v24, 1e-24 }
  0x91   :  { %1435 = vrsqrt.f32 %v181_v25 }
  0x92   :  { %1437 = vrsqrt.f32 %v183_v30  ;;  %v90_v31 = vpop.xlane.xlu0 %89  ;;  %v96_v32 = vpop.xlane.xlu1 %95 }
  0x93   :  { %v182_v33 = vmax.f32 %v90_v31, 1e-24  ;;  %v184_v38 = vmax.f32 %v96_v32, 1e-24 }
  0x95   :  { %1439 = vrsqrt.f32 %v182_v33 }
  0x96   :  { %1441 = vrsqrt.f32 %v184_v38  ;;  %v99_v39 = vpop.xlane.xlu0 %98  ;;  %v102_v42 = vpop.xlane.xlu1 %101 }
  0x97   :  { %v185_v43 = vmax.f32 %v99_v39, 1e-24  ;;  %v186_v48 = vmax.f32 %v102_v42, 1e-24 }
  0x99   :  { %1443 = vrsqrt.f32 %v185_v43 }
  0x9a   :  { %1445 = vrsqrt.f32 %v186_v48  ;;  %v105_v49 = vpop.xlane.xlu0 %104  ;;  %v108_v50 = vpop.xlane.xlu1 %107 }
  0x9b   :  { %v187_v51 = vmax.f32 %v105_v49, 1e-24  ;;  %v188_v52 = vmax.f32 %v108_v50, 1e-24 }
  0x9d   :  { %1447 = vrsqrt.f32 %v187_v51 }
  0x9e   :  { %v1436_v53 = vpop.eup %1435  ;;  %1449 = vrsqrt.f32 %v188_v52  ;;  %v111_v21 = vpop.xlane.xlu0 %110 }
  0x9f   :  { %v114_v24 = vpop.xlane.xlu1 %113  ;;  %v1438_v25 = vpop.eup %1437  ;;  %v245_v30 = vmul.f32 %v1436_v53, %v1596_v0  ;;  %v189_v31 = vmax.f32 %v111_v21, 1e-24 }
  0xa0   :  { %v190_v32 = vmax.f32 %v114_v24, 1e-24  ;;  %v247_v42 = vmul.f32 %v1438_v25, %v1601_v1 }
  0xa1   :  { %1275 = vmatprep.mubr.msk.f32.mxu0 %vm84_vm0, %v245_v30  ;;  %1451 = vrsqrt.f32 %v189_v31 }
  0xa2   :  { %v1440_v33 = vpop.eup %1439  ;;  %1453 = vrsqrt.f32 %v190_v32  ;;  %v117_v38 = vpop.xlane.xlu0 %116 }
  0xa3   :  { %v120_v39 = vpop.xlane.xlu1 %119  ;;  %v1442_v43 = vpop.eup %1441  ;;  %v246_v48 = vmul.f32 %v1440_v33, %v1606_v2  ;;  %v191_v49 = vmax.f32 %v117_v38, 1e-24 }
  0xa4   :  { %v192_v50 = vmax.f32 %v120_v39, 1e-24  ;;  %v248_v0 = vmul.f32 %v1442_v43, %v1617_v6 }
  0xa5   :  { %1276 = vmatmul.mubr.msk.f32.vlgmr.msra.gmra.mxu0 %vm84_vm0, %v246_v48  ;;  %1455 = vrsqrt.f32 %v191_v49 }
  0xa6   :  { %v1444_v51 = vpop.eup %1443  ;;  %1457 = vrsqrt.f32 %v192_v50  ;;  %1278 = vmatprep.mubr.msk.f32.mxu0 %vm84_vm0, %v247_v42  ;;  %v123_v52 = vpop.xlane.xlu0 %122  ;;  %1324 = vmatpush3.msra.mxu0 %v1864_v56 }
  0xa7   :  { %v126_v53 = vpop.xlane.xlu1 %125  ;;  %v1446_v21 = vpop.eup %1445  ;;  %v193_v1 = vmax.f32 %v123_v52, 1e-24  ;;  %v249_v2 = vmul.f32 %v1444_v51, %v1624_v8  ;;  %1325 = vmatprep.subr.mxu0 %v1871_v57 }
  0xa8   :  { %v194_v24 = vmax.f32 %v126_v53, 1e-24  ;;  %1326 = vmatpush3.msra.mxu0 %v1871_v57  ;;  %v250_v6 = vmul.f32 %v1446_v21, %v1629_v9 }
  0xa9   :  { %1279 = vmatmul.mubr.msk.f32.gmra.mxu0 %vm84_vm0, %v248_v0  ;;  %1459 = vrsqrt.f32 %v193_v1  ;;  %1327 = vmatprep.subr.mxu0 %v1878_v58 }
  0xaa   :  { %v1448_v25 = vpop.eup %1447  ;;  %1461 = vrsqrt.f32 %v194_v24  ;;  %1281 = vmatprep.mubr.msk.f32.mxu0 %vm84_vm0, %v249_v2  ;;  %v129_v56 = vpop.xlane.xlu0 %128  ;;  %1328 = vmatpush3.msra.mxu0 %v1878_v58 }
  0xab   :  { %v132_v30 = vpop.xlane.xlu1 %131  ;;  %v1450_v8 = vpop.eup %1449  ;;  %v195_v31 = vmax.f32 %v129_v56, 1e-24  ;;  %v251_v57 = vmul.f32 %v1448_v25, %v1642_v16  ;;  %1329 = vmatprep.subr.mxu0 %v1885_v59 }
  0xac   :  { %v196_v32 = vmax.f32 %v132_v30, 1e-24  ;;  %1330 = vmatpush3.msra.mxu0 %v1885_v59  ;;  %v252_v9 = vmul.f32 %v1450_v8, %v1647_v17 }
  0xad   :  { %1282 = vmatmul.mubr.msk.f32.gmra.mxu0 %vm84_vm0, %v250_v6  ;;  %1463 = vrsqrt.f32 %v195_v31  ;;  %1331 = vmatprep.subr.mxu0 %v1892_v60 }
  0xae   :  { %v1452_v33 = vpop.eup %1451  ;;  %1465 = vrsqrt.f32 %v196_v32  ;;  %1284 = vmatprep.mubr.msk.f32.mxu0 %vm84_vm0, %v251_v57  ;;  %v135_v58 = vpop.xlane.xlu0 %134  ;;  %1332 = vmatpush3.msra.mxu0 %v1892_v60 }
  0xaf   :  { %v138_v38 = vpop.xlane.xlu1 %137  ;;  %v1454_v16 = vpop.eup %1453  ;;  %v197_v39 = vmax.f32 %v135_v58, 1e-24  ;;  %v253_v59 = vmul.f32 %v1452_v33, %v1658_v22  ;;  %1333 = vmatprep.subr.mxu0 %v1899_v61 }
  0xb0   :  { %v198_v42 = vmax.f32 %v138_v38, 1e-24  ;;  %1334 = vmatpush3.msra.mxu0 %v1899_v61  ;;  %v254_v17 = vmul.f32 %v1454_v16, %v1663_v23 }
  0xb1   :  { %1285 = vmatmul.mubr.msk.f32.gmra.mxu0 %vm84_vm0, %v252_v9  ;;  %1467 = vrsqrt.f32 %v197_v39  ;;  %1335 = vmatprep.subr.mxu0 %v1906_v3 }
  0xb2   :  { %v1456_v43 = vpop.eup %1455  ;;  %1469 = vrsqrt.f32 %v198_v42  ;;  %1287 = vmatprep.mubr.msk.f32.mxu0 %vm84_vm0, %v253_v59  ;;  %v141_v60 = vpop.xlane.xlu0 %140  ;;  %1336 = vmatpush3.msra.mxu0 %v1906_v3 }
  0xb3   :  { %v144_v48 = vpop.xlane.xlu1 %143  ;;  %v1458_v22 = vpop.eup %1457  ;;  %v199_v49 = vmax.f32 %v141_v60, 1e-24  ;;  %v255_v61 = vmul.f32 %v1456_v43, %v1674_v28  ;;  %1337 = vmatprep.subr.mxu0 %v1913_v4 }
  0xb4   :  { %v200_v50 = vmax.f32 %v144_v48, 1e-24  ;;  %1338 = vmatpush3.msra.mxu0 %v1913_v4  ;;  %v256_v23 = vmul.f32 %v1458_v22, %v1679_v29 }
  0xb5   :  { %1288 = vmatmul.mubr.msk.f32.gmra.mxu0 %vm84_vm0, %v254_v17  ;;  %1471 = vrsqrt.f32 %v199_v49  ;;  %1339 = vmatprep.subr.mxu0 %v1920_v5 }
  0xb6   :  { %v1460_v0 = vpop.eup %1459  ;;  %1473 = vrsqrt.f32 %v200_v50  ;;  %1290 = vmatprep.mubr.msk.f32.mxu0 %vm84_vm0, %v255_v61  ;;  %v147_v3 = vpop.xlane.xlu0 %146  ;;  %1340 = vmatpush3.msra.mxu0 %v1920_v5 }
  0xb7   :  { %v150_v51 = vpop.xlane.xlu1 %149  ;;  %v1462_v28 = vpop.eup %1461  ;;  %v201_v52 = vmax.f32 %v147_v3, 1e-24  ;;  %v257_v4 = vmul.f32 %v1460_v0, %v1690_v34  ;;  %1341 = vmatprep.subr.mxu0 %v1927_v7 }
  0xb8   :  { %v202_v53 = vmax.f32 %v150_v51, 1e-24  ;;  %1342 = vmatpush3.msra.mxu0 %v1927_v7  ;;  %v258_v29 = vmul.f32 %v1462_v28, %v1695_v35 }
  0xb9   :  { %1291 = vmatmul.mubr.msk.f32.gmra.mxu0 %vm84_vm0, %v256_v23  ;;  %1475 = vrsqrt.f32 %v201_v52  ;;  %1343 = vmatprep.subr.mxu0 %v1934_v12 }
  0xba   :  { %v1464_v21 = vpop.eup %1463  ;;  %1477 = vrsqrt.f32 %v202_v53  ;;  %1293 = vmatprep.mubr.msk.f32.mxu0 %vm84_vm0, %v257_v4  ;;  %v153_v5 = vpop.xlane.xlu0 %152  ;;  %1344 = vmatpush3.msra.mxu0 %v1934_v12 }
  0xbb   :  { %v156_v1 = vpop.xlane.xlu1 %155  ;;  %v1466_v34 = vpop.eup %1465  ;;  %v203_v24 = vmax.f32 %v153_v5, 1e-24  ;;  %v259_v7 = vmul.f32 %v1464_v21, %v1706_v40  ;;  %1345 = vmatprep.subr.mxu0 %v1941_v13 }
  0xbc   :  { %v204_v2 = vmax.f32 %v156_v1, 1e-24  ;;  %1346 = vmatpush3.msra.mxu0 %v1941_v13  ;;  %v260_v35 = vmul.f32 %v1466_v34, %v1711_v41 }
  0xbd   :  { %1294 = vmatmul.mubr.msk.f32.gmra.mxu0 %vm84_vm0, %v258_v29  ;;  %1479 = vrsqrt.f32 %v203_v24  ;;  %1347 = vmatprep.subr.mxu0 %v1948_v14 }
  0xbe   :  { %v1468_v6 = vpop.eup %1467  ;;  %1481 = vrsqrt.f32 %v204_v2  ;;  %1296 = vmatprep.mubr.msk.f32.mxu0 %vm84_vm0, %v259_v7  ;;  %v159_v12 = vpop.xlane.xlu0 %158  ;;  %1348 = vmatpush3.msra.mxu0 %v1948_v14 }
  0xbf   :  { %v162_v25 = vpop.xlane.xlu1 %161  ;;  %v1470_v40 = vpop.eup %1469  ;;  %v205_v56 = vmax.f32 %v159_v12, 1e-24  ;;  %v261_v13 = vmul.f32 %v1468_v6, %v1722_v46  ;;  %1349 = vmatprep.subr.mxu0 %v1955_v15 }
  0xc0   :  { %v206_v30 = vmax.f32 %v162_v25, 1e-24  ;;  %1350 = vmatpush3.msra.mxu0 %v1955_v15  ;;  %v262_v41 = vmul.f32 %v1470_v40, %v1727_v47 }
  0xc1   :  { %1297 = vmatmul.mubr.msk.f32.gmra.mxu0 %vm84_vm0, %v260_v35  ;;  %1483 = vrsqrt.f32 %v205_v56  ;;  %1351 = vmatprep.subr.mxu0 %v1962_v20 }
  0xc2   :  { %v1472_v8 = vpop.eup %1471  ;;  %1485 = vrsqrt.f32 %v206_v30  ;;  %1299 = vmatprep.mubr.msk.f32.mxu0 %vm84_vm0, %v261_v13  ;;  %v165_v14 = vpop.xlane.xlu0 %164  ;;  %1352 = vmatpush3.msra.mxu0 %v1962_v20 }
  0xc3   :  { %v168_v31 = vpop.xlane.xlu1 %167  ;;  %v1474_v46 = vpop.eup %1473  ;;  %v207_v32 = vmax.f32 %v165_v14, 1e-24  ;;  %v263_v15 = vmul.f32 %v1472_v8, %v1744_v54 }
  0xc4   :  { %v208_v57 = vmax.f32 %v168_v31, 1e-24  ;;  %v264_v47 = vmul.f32 %v1474_v46, %v1749_v55 }
  0xc5   :  { %1300 = vmatmul.mubr.msk.f32.gmra.mxu0 %vm84_vm0, %v262_v41  ;;  %1487 = vrsqrt.f32 %v207_v32 }
  0xc6   :  { %v1476_v9 = vpop.eup %1475  ;;  %1489 = vrsqrt.f32 %v208_v57  ;;  %1302 = vmatprep.mubr.msk.f32.mxu0 %vm84_vm0, %v263_v15  ;;  %v171_v33 = vpop.xlane.xlu0 %170 }
  0xc7   :  { %v174_v58 = vpop.xlane.xlu1 %173  ;;  %v1478_v38 = vpop.eup %1477  ;;  %v209_v16 = vmax.f32 %v171_v33, 1e-24  ;;  %v265_v20 = vmul.f32 %v1476_v9, %v1766_v62 }
  0xc8   :  { %v210_v39 = vmax.f32 %v174_v58, 1e-24  ;;  %v266_v54 = vmul.f32 %v1478_v38, %v1771_v63 }
  0xc9   :  { %1303 = vmatmul.mubr.msk.f32.gmra.mxu0 %vm84_vm0, %v264_v47  ;;  %1491 = vrsqrt.f32 %v209_v16 }
  0xca   :  { %v1480_v42 = vpop.eup %1479  ;;  %1493 = vrsqrt.f32 %v210_v39  ;;  %1305 = vmatprep.mubr.msk.f32.mxu0 %vm84_vm0, %v265_v20  ;;  %v177_v55 = vpop.xlane.xlu0 %176 }
  0xcb   :  { %v180_v59 = vpop.xlane.xlu1 %179  ;;  %v1482_v17 = vpop.eup %1481  ;;  %v211_v43 = vmax.f32 %v177_v55, 1e-24  ;;  %v267_v48 = vmul.f32 %v1480_v42, %v1782_v10 }
  0xcc   :  { %v212_v60 = vmax.f32 %v180_v59, 1e-24  ;;  %v268_v62 = vmul.f32 %v1482_v17, %v1787_v11 }
  0xcd   :  { %1306 = vmatmul.mubr.msk.f32.gmra.mxu0 %vm84_vm0, %v266_v54  ;;  %1495 = vrsqrt.f32 %v211_v43 }
  0xce   :  { %v1484_v22 = vpop.eup %1483  ;;  %1497 = vrsqrt.f32 %v212_v60  ;;  %1308 = vmatprep.mubr.msk.f32.mxu0 %vm84_vm0, %v267_v48 }
  0xcf   :  { %v1486_v63 = vpop.eup %1485  ;;  %v269_v49 = vmul.f32 %v1484_v22, %v1798_v18 }
  0xd0   :  { %v270_v50 = vmul.f32 %v1486_v63, %v1803_v19 }
  0xd1   :  { %1309 = vmatmul.mubr.msk.f32.gmra.mxu0 %vm84_vm0, %v268_v62 }
  0xd2   :  { %v1488_v61 = vpop.eup %1487  ;;  %1311 = vmatprep.mubr.msk.f32.mxu0 %vm84_vm0, %v269_v49 }
  0xd3   :  { %v1490_v10 = vpop.eup %1489  ;;  %v271_v23 = vmul.f32 %v1488_v61, %v1814_v26 }
  0xd4   :  { %v272_v11 = vmul.f32 %v1490_v10, %v1819_v27 }
  0xd5   :  { %1312 = vmatmul.mubr.msk.f32.gmra.mxu0 %vm84_vm0, %v270_v50 }
  0xd6   :  { %v1492_v0 = vpop.eup %1491  ;;  %1314 = vmatprep.mubr.msk.f32.mxu0 %vm84_vm0, %v271_v23 }
  0xd7   :  { %v1494_v3 = vpop.eup %1493  ;;  %v273_v18 = vmul.f32 %v1492_v0, %v1830_v36  ;;  %v641_v36 = vld [vmem:[%s2459_s3] sm:$0xff] }
  0xd8   :  { %v274_v19 = vmul.f32 %v1494_v3, %v1835_v37  ;;  %1353 = vmatprep.subr.mxu0 %v641_v36  ;;  %1418 = vmatprep.subr.mxu1 %v641_v36  ;;  %v2066_v37 = vld [vmem:[%s2460_s2] ss:$0 sm:$0xff] }
  0xd9   :  { %1315 = vmatmul.mubr.msk.f32.gmra.mxu0 %vm84_vm0, %v272_v11  ;;  %1434 = vmatpush3.msra.mxu1 %v641_v36 }
  0xda   :  { %v1496_v51 = vpop.eup %1495  ;;  %1317 = vmatprep.mubr.msk.f32.mxu0 %vm84_vm0, %v273_v18  ;;  %1354 = vmatpush3.msra.mxu0 %v641_v36 }
  0xdb   :  { %v1498_v28 = vpop.eup %1497  ;;  %v275_v26 = vmul.f32 %v1496_v51, %v1846_v44 }
  0xdc   :  { %v276_v27 = vmul.f32 %v1498_v28, %v1851_v45 }
  0xdd   :  { %1318 = vmatmul.mubr.msk.f32.gmra.mxu0 %vm84_vm0, %v274_v19 }
  0xde   :  { %1320 = vmatprep.mubr.msk.f32.mxu0 %vm84_vm0, %v275_v26 }
  0xe1   :  { %1321 = vmatmul.mubr.msk.f32.gmra.mxu0 %vm84_vm0, %v276_v27 }
 0x165   :  { %v1277_v44 = vpop.f32.mrf.mxu0 }
 0x166   :  { %v456_v45 = vadd.f32 %v1277_v44, %v2066_v37 }
 0x167   :  { %v450_v52 = vpop.f32.mrf.mxu0 }
 0x168   :  { %v451_v53 = vadd.f32 %v2066_v37, %v450_v52  ;;  %v610_v21 = vmax.f32 %v456_v45, 0.0 }
 0x169   :  { %v1280_v4 = vpop.f32.mrf.mxu0 }
 0x16a   :  { %v609_v29 = vmax.f32 %v451_v53, 0.0  ;;  %v466_v5 = vadd.f32 %v1280_v4, %v2066_v37 }
 0x16b   :  { %v460_v1 = vpop.f32.mrf.mxu0 }
 0x16c   :  { %v461_v34 = vadd.f32 %v2066_v37, %v460_v1  ;;  %1355 = vmatprep.mubr.f32.mxu0 %v609_v29  ;;  %v612_v7 = vmax.f32 %v466_v5, 0.0 }
 0x16d   :  { %v1283_v24 = vpop.f32.mrf.mxu0  ;;  %1356 = vmatmul.mubr.f32.vlgmr.msra.gmra.mxu0 %v610_v21 }
 0x16e   :  { %v611_v2 = vmax.f32 %v461_v34, 0.0  ;;  %v476_v35 = vadd.f32 %v1283_v24, %v2066_v37 }
 0x16f   :  { %v470_v6 = vpop.f32.mrf.mxu0 }
 0x170   :  { %v471_v12 = vadd.f32 %v2066_v37, %v470_v6  ;;  %1358 = vmatprep.mubr.f32.mxu0 %v611_v2  ;;  %v614_v56 = vmax.f32 %v476_v35, 0.0 }
 0x171   :  { %v1286_v25 = vpop.f32.mrf.mxu0  ;;  %1359 = vmatmul.mubr.f32.gmra.mxu0 %v612_v7 }
 0x172   :  { %v613_v40 = vmax.f32 %v471_v12, 0.0  ;;  %v486_v30 = vadd.f32 %v1286_v25, %v2066_v37 }
 0x173   :  { %v480_v13 = vpop.f32.mrf.mxu0 }
 0x174   :  { %1361 = vmatprep.mubr.f32.mxu0 %v613_v40  ;;  %v481_v41 = vadd.f32 %v2066_v37, %v480_v13  ;;  %v616_v31 = vmax.f32 %v486_v30, 0.0 }
 0x175   :  { %v1289_v8 = vpop.f32.mrf.mxu0  ;;  %1362 = vmatmul.mubr.f32.gmra.mxu0 %v614_v56 }
 0x176   :  { %v615_v14 = vmax.f32 %v481_v41, 0.0  ;;  %v496_v46 = vadd.f32 %v1289_v8, %v2066_v37 }
 0x177   :  { %v490_v32 = vpop.f32.mrf.mxu0 }
 0x178   :  { %v491_v57 = vadd.f32 %v2066_v37, %v490_v32  ;;  %1364 = vmatprep.mubr.f32.mxu1 %v615_v14  ;;  %v618_v9 = vmax.f32 %v496_v46, 0.0 }
 0x179   :  { %v1292_v15 = vpop.f32.mrf.mxu0  ;;  %1365 = vmatmul.mubr.f32.vlgmr.msra.gmra.mxu1 %v616_v31 }
 0x17a   :  { %v617_v47 = vmax.f32 %v491_v57, 0.0  ;;  %v506_v33 = vadd.f32 %v1292_v15, %v2066_v37 }
 0x17b   :  { %v500_v58 = vpop.f32.mrf.mxu0 }
 0x17c   :  { %v501_v38 = vadd.f32 %v2066_v37, %v500_v58  ;;  %1367 = vmatprep.mubr.f32.mxu1 %v617_v47  ;;  %v620_v20 = vmax.f32 %v506_v33, 0.0 }
 0x17d   :  { %v1295_v16 = vpop.f32.mrf.mxu0  ;;  %1368 = vmatmul.mubr.f32.gmra.mxu1 %v618_v9 }
 0x17e   :  { %v619_v39 = vmax.f32 %v501_v38, 0.0  ;;  %v516_v54 = vadd.f32 %v1295_v16, %v2066_v37  ;;  %v2103_v38 = vld [vmem:[%s2461_s4] ss:$0 sm:$0xff] }
 0x17f   :  { %v510_v42 = vpop.f32.mrf.mxu0 }
 0x180   :  { %v511_v55 = vadd.f32 %v2066_v37, %v510_v42  ;;  %1370 = vmatprep.mubr.f32.mxu1 %v619_v39  ;;  %v622_v43 = vmax.f32 %v516_v54, 0.0 }
 0x181   :  { %v1298_v59 = vpop.f32.mrf.mxu0  ;;  %1371 = vmatmul.mubr.f32.gmra.mxu1 %v620_v20 }
 0x182   :  { %v621_v17 = vmax.f32 %v511_v55, 0.0  ;;  %v526_v60 = vadd.f32 %v1298_v59, %v2066_v37 }
 0x183   :  { %v520_v48 = vpop.f32.mrf.mxu0 }
 0x184   :  { %v521_v62 = vadd.f32 %v2066_v37, %v520_v48  ;;  %1373 = vmatprep.mubr.f32.mxu1 %v621_v17  ;;  %v624_v49 = vmax.f32 %v526_v60, 0.0 }
 0x185   :  { %v1301_v22 = vpop.f32.mrf.mxu0  ;;  %1374 = vmatmul.mubr.f32.gmra.mxu1 %v622_v43 }
 0x186   :  { %v623_v63 = vmax.f32 %v521_v62, 0.0  ;;  %v536_v50 = vadd.f32 %v1301_v22, %v2066_v37 }
 0x187   :  { %v530_v61 = vpop.f32.mrf.mxu0 }
 0x188   :  { %v531_v10 = vadd.f32 %v2066_v37, %v530_v61  ;;  %1376 = vmatprep.mubr.f32.mxu1 %v623_v63  ;;  %v626_v0 = vmax.f32 %v536_v50, 0.0 }
 0x189   :  { %v1304_v23 = vpop.f32.mrf.mxu0  ;;  %1377 = vmatmul.mubr.f32.gmra.mxu1 %v624_v49 }
 0x18a   :  { %v625_v11 = vmax.f32 %v531_v10, 0.0  ;;  %v546_v3 = vadd.f32 %v1304_v23, %v2066_v37 }
 0x18b   :  { %v540_v18 = vpop.f32.mrf.mxu0 }
 0x18c   :  { %v541_v19 = vadd.f32 %v2066_v37, %v540_v18  ;;  %1379 = vmatprep.mubr.f32.mxu1 %v625_v11  ;;  %v628_v26 = vmax.f32 %v546_v3, 0.0 }
 0x18d   :  { %v1307_v51 = vpop.f32.mrf.mxu0  ;;  %1380 = vmatmul.mubr.f32.gmra.mxu1 %v626_v0 }
 0x18e   :  { %v627_v28 = vmax.f32 %v541_v19, 0.0  ;;  %v556_v27 = vadd.f32 %v1307_v51, %v2066_v37 }
 0x18f   :  { %v550_v36 = vpop.f32.mrf.mxu0 }
 0x190   :  { %v551_v44 = vadd.f32 %v2066_v37, %v550_v36  ;;  %1382 = vmatprep.mubr.f32.mxu1 %v627_v28  ;;  %v630_v53 = vmax.f32 %v556_v27, 0.0 }
 0x191   :  { %v1310_v45 = vpop.f32.mrf.mxu0  ;;  %1383 = vmatmul.mubr.f32.gmra.mxu1 %v628_v26 }
 0x192   :  { %v629_v52 = vmax.f32 %v551_v44, 0.0  ;;  %v566_v4 = vadd.f32 %v1310_v45, %v2066_v37 }
 0x193   :  { %v560_v29 = vpop.f32.mrf.mxu0 }
 0x194   :  { %v561_v21 = vadd.f32 %v2066_v37, %v560_v29  ;;  %1385 = vmatprep.mubr.f32.mxu1 %v629_v52  ;;  %v632_v34 = vmax.f32 %v566_v4, 0.0 }
 0x195   :  { %v1313_v5 = vpop.f32.mrf.mxu0  ;;  %1386 = vmatmul.mubr.f32.gmra.mxu1 %v630_v53 }
 0x196   :  { %v631_v1 = vmax.f32 %v561_v21, 0.0  ;;  %v576_v24 = vadd.f32 %v1313_v5, %v2066_v37 }
 0x197   :  { %v570_v2 = vpop.f32.mrf.mxu0 }
 0x198   :  { %v571_v7 = vadd.f32 %v2066_v37, %v570_v2  ;;  %1388 = vmatprep.mubr.f32.mxu1 %v631_v1  ;;  %v634_v12 = vmax.f32 %v576_v24, 0.0 }
 0x199   :  { %v1316_v35 = vpop.f32.mrf.mxu0  ;;  %1389 = vmatmul.mubr.f32.gmra.mxu1 %v632_v34 }
 0x19a   :  { %v633_v6 = vmax.f32 %v571_v7, 0.0  ;;  %v586_v25 = vadd.f32 %v1316_v35, %v2066_v37 }
 0x19b   :  { %v580_v40 = vpop.f32.mrf.mxu0 }
 0x19c   :  { %v581_v56 = vadd.f32 %v2066_v37, %v580_v40  ;;  %1391 = vmatprep.mubr.f32.mxu1 %v633_v6  ;;  %v636_v41 = vmax.f32 %v586_v25, 0.0 }
 0x19d   :  { %v1319_v30 = vpop.f32.mrf.mxu0  ;;  %1392 = vmatmul.mubr.f32.gmra.mxu1 %v634_v12 }
 0x19e   :  { %v635_v13 = vmax.f32 %v581_v56, 0.0  ;;  %v596_v8 = vadd.f32 %v1319_v30, %v2066_v37 }
 0x19f   :  { %v590_v14 = vpop.f32.mrf.mxu0 }
 0x1a0   :  { %v591_v31 = vadd.f32 %v2066_v37, %v590_v14  ;;  %1394 = vmatprep.mubr.f32.mxu1 %v635_v13  ;;  %v638_v57 = vmax.f32 %v596_v8, 0.0 }
 0x1a1   :  { %v1322_v46 = vpop.f32.mrf.mxu0  ;;  %1395 = vmatmul.mubr.f32.gmra.mxu1 %v636_v41 }
 0x1a2   :  { %v637_v32 = vmax.f32 %v591_v31, 0.0  ;;  %v606_v15 = vadd.f32 %v1322_v46, %v2066_v37 }
 0x1a3   :  { %v600_v47 = vpop.f32.mrf.mxu0 }
 0x1a4   :  { %v601_v9 = vadd.f32 %v2066_v37, %v600_v47  ;;  %1397 = vmatprep.mubr.f32.mxu1 %v637_v32  ;;  %v640_v58 = vmax.f32 %v606_v15, 0.0 }
 0x1a5   :  { %1398 = vmatmul.mubr.f32.gmra.mxu1 %v638_v57 }
 0x1a6   :  { %v639_v33 = vmax.f32 %v601_v9, 0.0 }
 0x1a8   :  { %1400 = vmatprep.mubr.f32.mxu1 %v639_v33 }
 0x1a9   :  { %1401 = vmatmul.mubr.f32.gmra.mxu1 %v640_v58 }
 0x22d   :  { %v1357_v16 = vpop.f32.mrf.mxu0 }
 0x22e   :  { %v2106_v39 = vadd.f32 %v1357_v16, %v2103_v38 }
 0x22f   :  { %v730_v20 = vpop.f32.mrf.mxu0 }
 0x230   :  { %v2109_v54 = vadd.f32 %v2103_v38, %v730_v20  ;;  %v890_v37 = vmul.f32 %v2106_v39, %v2106_v39 }
 0x231   :  { %v1360_v42 = vpop.f32.mrf.mxu0 }
 0x232   :  { %v2114_v55 = vadd.f32 %v1360_v42, %v2103_v38  ;;  %v924_v59 = vsel %vm84_vm0, %v890_v37, 0.0  ;;  %v889_v17 = vmul.f32 %v2109_v54, %v2109_v54 }
 0x233   :  { %925 = vadd.xlane.f32.xlu1 %v924_v59  ;;  %v740_v43 = vpop.f32.mrf.mxu0 }
 0x234   :  { %v2120_v60 = vadd.f32 %v2103_v38, %v740_v43  ;;  %v921_v48 = vsel %vm84_vm0, %v889_v17, 0.0  ;;  %v892_v62 = vmul.f32 %v2114_v55, %v2114_v55 }
 0x235   :  { %v1363_v22 = vpop.f32.mrf.mxu0  ;;  %922 = vadd.xlane.f32.xlu0 %v921_v48 }
 0x236   :  { %v2126_v63 = vadd.f32 %v1363_v22, %v2103_v38  ;;  %v930_v49 = vsel %vm84_vm0, %v892_v62, 0.0  ;;  %v891_v50 = vmul.f32 %v2120_v60, %v2120_v60 }
 0x237   :  { %931 = vadd.xlane.f32.xlu1 %v930_v49  ;;  %v750_v61 = vpop.f32.mrf.mxu0 }
 0x238   :  { %v2132_v10 = vadd.f32 %v2103_v38, %v750_v61  ;;  %v927_v23 = vsel %vm84_vm0, %v891_v50, 0.0  ;;  %v894_v11 = vmul.f32 %v2126_v63, %v2126_v63 }
 0x239   :  { %v1366_v0 = vpop.f32.mrf.mxu1  ;;  %928 = vadd.xlane.f32.xlu0 %v927_v23 }
 0x23a   :  { %v2138_v3 = vadd.f32 %v1366_v0, %v2103_v38  ;;  %v936_v18 = vsel %vm84_vm0, %v894_v11, 0.0  ;;  %v893_v19 = vmul.f32 %v2132_v10, %v2132_v10 }
 0x23b   :  { %v760_v51 = vpop.f32.mrf.mxu1  ;;  %937 = vadd.xlane.f32.xlu1 %v936_v18 }
 0x23c   :  { %v2144_v28 = vadd.f32 %v2103_v38, %v760_v51  ;;  %v933_v26 = vsel %vm84_vm0, %v893_v19, 0.0  ;;  %v896_v27 = vmul.f32 %v2138_v3, %v2138_v3 }
 0x23d   :  { %v1369_v36 = vpop.f32.mrf.mxu1  ;;  %934 = vadd.xlane.f32.xlu0 %v933_v26 }
 0x23e   :  { %v2150_v44 = vadd.f32 %v1369_v36, %v2103_v38  ;;  %v942_v45 = vsel %vm84_vm0, %v896_v27, 0.0  ;;  %v895_v52 = vmul.f32 %v2144_v28, %v2144_v28 }
 0x23f   :  { %v770_v53 = vpop.f32.mrf.mxu1  ;;  %943 = vadd.xlane.f32.xlu1 %v942_v45 }
 0x240   :  { %v2156_v4 = vadd.f32 %v2103_v38, %v770_v53  ;;  %v939_v29 = vsel %vm84_vm0, %v895_v52, 0.0  ;;  %v898_v21 = vmul.f32 %v2150_v44, %v2150_v44 }
 0x241   :  { %v1372_v5 = vpop.f32.mrf.mxu1  ;;  %940 = vadd.xlane.f32.xlu0 %v939_v29 }
 0x242   :  { %v2162_v1 = vadd.f32 %v1372_v5, %v2103_v38  ;;  %v948_v34 = vsel %vm84_vm0, %v898_v21, 0.0  ;;  %v897_v24 = vmul.f32 %v2156_v4, %v2156_v4 }
 0x243   :  { %v780_v2 = vpop.f32.mrf.mxu1  ;;  %949 = vadd.xlane.f32.xlu1 %v948_v34 }
 0x244   :  { %v2168_v7 = vadd.f32 %v2103_v38, %v780_v2  ;;  %v945_v35 = vsel %vm84_vm0, %v897_v24, 0.0  ;;  %v900_v6 = vmul.f32 %v2162_v1, %v2162_v1 }
 0x245   :  { %v1375_v12 = vpop.f32.mrf.mxu1  ;;  %946 = vadd.xlane.f32.xlu0 %v945_v35 }
 0x246   :  { %v2174_v25 = vadd.f32 %v1375_v12, %v2103_v38  ;;  %v954_v40 = vsel %vm84_vm0, %v900_v6, 0.0  ;;  %v899_v56 = vmul.f32 %v2168_v7, %v2168_v7 }
 0x247   :  { %v790_v30 = vpop.f32.mrf.mxu1  ;;  %955 = vadd.xlane.f32.xlu1 %v954_v40 }
 0x248   :  { %v2180_v13 = vadd.f32 %v2103_v38, %v790_v30  ;;  %v951_v41 = vsel %vm84_vm0, %v899_v56, 0.0  ;;  %v902_v8 = vmul.f32 %v2174_v25, %v2174_v25 }
 0x249   :  { %v1378_v14 = vpop.f32.mrf.mxu1  ;;  %952 = vadd.xlane.f32.xlu0 %v951_v41 }
 0x24a   :  { %v2186_v31 = vadd.f32 %v1378_v14, %v2103_v38  ;;  %v960_v46 = vsel %vm84_vm0, %v902_v8, 0.0  ;;  %v901_v32 = vmul.f32 %v2180_v13, %v2180_v13 }
 0x24b   :  { %v800_v57 = vpop.f32.mrf.mxu1  ;;  %961 = vadd.xlane.f32.xlu1 %v960_v46 }
 0x24c   :  { %v2192_v15 = vadd.f32 %v2103_v38, %v800_v57  ;;  %v957_v47 = vsel %vm84_vm0, %v901_v32, 0.0  ;;  %v904_v9 = vmul.f32 %v2186_v31, %v2186_v31 }
 0x24d   :  { %v1381_v33 = vpop.f32.mrf.mxu1  ;;  %958 = vadd.xlane.f32.xlu0 %v957_v47 }
 0x24e   :  { %v2198_v58 = vadd.f32 %v1381_v33, %v2103_v38  ;;  %v966_v16 = vsel %vm84_vm0, %v904_v9, 0.0  ;;  %v903_v20 = vmul.f32 %v2192_v15, %v2192_v15 }
 0x24f   :  { %v810_v37 = vpop.f32.mrf.mxu1  ;;  %967 = vadd.xlane.f32.xlu1 %v966_v16 }
 0x250   :  { %v2204_v42 = vadd.f32 %v2103_v38, %v810_v37  ;;  %v963_v59 = vsel %vm84_vm0, %v903_v20, 0.0  ;;  %v906_v17 = vmul.f32 %v2198_v58, %v2198_v58 }
 0x251   :  { %v1384_v43 = vpop.f32.mrf.mxu1  ;;  %964 = vadd.xlane.f32.xlu0 %v963_v59 }
 0x252   :  { %v2210_v48 = vadd.f32 %v1384_v43, %v2103_v38  ;;  %v972_v62 = vsel %vm84_vm0, %v906_v17, 0.0  ;;  %v905_v22 = vmul.f32 %v2204_v42, %v2204_v42 }
 0x253   :  { %v820_v49 = vpop.f32.mrf.mxu1  ;;  %973 = vadd.xlane.f32.xlu1 %v972_v62 }
 0x254   :  { %v2216_v50 = vadd.f32 %v2103_v38, %v820_v49  ;;  %v969_v61 = vsel %vm84_vm0, %v905_v22, 0.0  ;;  %v908_v23 = vmul.f32 %v2210_v48, %v2210_v48 }
 0x255   :  { %v1387_v11 = vpop.f32.mrf.mxu1  ;;  %970 = vadd.xlane.f32.xlu0 %v969_v61 }
 0x256   :  { %v2222_v0 = vadd.f32 %v1387_v11, %v2103_v38  ;;  %v978_v18 = vsel %vm84_vm0, %v908_v23, 0.0  ;;  %v907_v19 = vmul.f32 %v2216_v50, %v2216_v50 }
 0x257   :  { %v830_v51 = vpop.f32.mrf.mxu1  ;;  %979 = vadd.xlane.f32.xlu1 %v978_v18 }
 0x258   :  { %v2228_v26 = vadd.f32 %v2103_v38, %v830_v51  ;;  %v975_v27 = vsel %vm84_vm0, %v907_v19, 0.0  ;;  %v910_v36 = vmul.f32 %v2222_v0, %v2222_v0 }
 0x259   :  { %v1390_v45 = vpop.f32.mrf.mxu1  ;;  %976 = vadd.xlane.f32.xlu0 %v975_v27 }
 0x25a   :  { %v2234_v52 = vadd.f32 %v1390_v45, %v2103_v38  ;;  %v984_v53 = vsel %vm84_vm0, %v910_v36, 0.0  ;;  %v909_v29 = vmul.f32 %v2228_v26, %v2228_v26 }
 0x25b   :  { %v840_v21 = vpop.f32.mrf.mxu1  ;;  %985 = vadd.xlane.f32.xlu1 %v984_v53 }
 0x25c   :  { %v2240_v5 = vadd.f32 %v2103_v38, %v840_v21  ;;  %v981_v34 = vsel %vm84_vm0, %v909_v29, 0.0  ;;  %v912_v24 = vmul.f32 %v2234_v52, %v2234_v52 }
 0x25d   :  { %v1393_v2 = vpop.f32.mrf.mxu1  ;;  %982 = vadd.xlane.f32.xlu0 %v981_v34 }
 0x25e   :  { %v2246_v35 = vadd.f32 %v1393_v2, %v2103_v38  ;;  %v990_v6 = vsel %vm84_vm0, %v912_v24, 0.0  ;;  %v911_v12 = vmul.f32 %v2240_v5, %v2240_v5 }
 0x25f   :  { %v850_v40 = vpop.f32.mrf.mxu1  ;;  %991 = vadd.xlane.f32.xlu1 %v990_v6 }
 0x260   :  { %v2252_v56 = vadd.f32 %v2103_v38, %v850_v40  ;;  %v987_v30 = vsel %vm84_vm0, %v911_v12, 0.0  ;;  %v914_v41 = vmul.f32 %v2246_v35, %v2246_v35 }
 0x261   :  { %v1396_v8 = vpop.f32.mrf.mxu1  ;;  %988 = vadd.xlane.f32.xlu0 %v987_v30 }
 0x262   :  { %v2258_v14 = vadd.f32 %v1396_v8, %v2103_v38  ;;  %v996_v46 = vsel %vm84_vm0, %v914_v41, 0.0  ;;  %v913_v32 = vmul.f32 %v2252_v56, %v2252_v56 }
 0x263   :  { %v860_v57 = vpop.f32.mrf.mxu1  ;;  %997 = vadd.xlane.f32.xlu1 %v996_v46 }
 0x264   :  { %v2264_v47 = vadd.f32 %v2103_v38, %v860_v57  ;;  %v993_v9 = vsel %vm84_vm0, %v913_v32, 0.0  ;;  %v916_v33 = vmul.f32 %v2258_v14, %v2258_v14 }
 0x265   :  { %v1399_v16 = vpop.f32.mrf.mxu1  ;;  %994 = vadd.xlane.f32.xlu0 %v993_v9 }
 0x266   :  { %v2270_v20 = vadd.f32 %v1399_v16, %v2103_v38  ;;  %v1002_v37 = vsel %vm84_vm0, %v916_v33, 0.0  ;;  %v915_v59 = vmul.f32 %v2264_v47, %v2264_v47 }
 0x267   :  { %v870_v17 = vpop.f32.mrf.mxu1  ;;  %1003 = vadd.xlane.f32.xlu1 %v1002_v37 }
 0x268   :  { %v2276_v43 = vadd.f32 %v2103_v38, %v870_v17  ;;  %v999_v62 = vsel %vm84_vm0, %v915_v59, 0.0  ;;  %v918_v22 = vmul.f32 %v2270_v20, %v2270_v20 }
 0x269   :  { %1000 = vadd.xlane.f32.xlu0 %v999_v62  ;;  %v1402_v49 = vpop.f32.mrf.mxu1 }
 0x26a   :  { %v2282_v61 = vadd.f32 %v1402_v49, %v2103_v38  ;;  %v1008_v23 = vsel %vm84_vm0, %v918_v22, 0.0  ;;  %v917_v11 = vmul.f32 %v2276_v43, %v2276_v43 }
 0x26b   :  { %1009 = vadd.xlane.f32.xlu1 %v1008_v23  ;;  %v880_v18 = vpop.f32.mrf.mxu1 }
 0x26c   :  { %v2288_v19 = vadd.f32 %v2103_v38, %v880_v18  ;;  %v1005_v51 = vsel %vm84_vm0, %v917_v11, 0.0  ;;  %v920_v27 = vmul.f32 %v2282_v61, %v2282_v61 }
 0x26d   :  { %1006 = vadd.xlane.f32.xlu0 %v1005_v51 }
 0x26e   :  { %v1014_v36 = vsel %vm84_vm0, %v920_v27, 0.0  ;;  %v919_v45 = vmul.f32 %v2288_v19, %v2288_v19 }
 0x26f   :  { %1015 = vadd.xlane.f32.xlu1 %v1014_v36 }
 0x270   :  { %v1011_v53 = vsel %vm84_vm0, %v919_v45, 0.0 }
 0x271   :  { %1012 = vadd.xlane.f32.xlu0 %v1011_v53 }
 0x2bc   :  { %v926_v29 = vpop.xlane.xlu1 %925 }
 0x2bd   :  { %v1018_v21 = vmax.f32 %v926_v29, 1e-24 }
 0x2be   :  { %v923_v34 = vpop.xlane.xlu0 %922 }
 0x2bf   :  { %1499 = vrsqrt.f32 %v1018_v21  ;;  %v1017_v38 = vmax.f32 %v923_v34, 1e-24 }
 0x2c0   :  { %v932_v24 = vpop.xlane.xlu1 %931 }
 0x2c1   :  { %1501 = vrsqrt.f32 %v1017_v38  ;;  %v1020_v2 = vmax.f32 %v932_v24, 1e-24 }
 0x2c2   :  { %v929_v6 = vpop.xlane.xlu0 %928 }
 0x2c3   :  { %1503 = vrsqrt.f32 %v1020_v2  ;;  %v1019_v12 = vmax.f32 %v929_v6, 1e-24 }
 0x2c4   :  { %v938_v40 = vpop.xlane.xlu1 %937 }
 0x2c5   :  { %1505 = vrsqrt.f32 %v1019_v12  ;;  %v1022_v30 = vmax.f32 %v938_v40, 1e-24 }
 0x2c6   :  { %v935_v41 = vpop.xlane.xlu0 %934 }
 0x2c7   :  { %1507 = vrsqrt.f32 %v1022_v30  ;;  %v1021_v8 = vmax.f32 %v935_v41, 1e-24 }
 0x2c8   :  { %v944_v46 = vpop.xlane.xlu1 %943 }
 0x2c9   :  { %1509 = vrsqrt.f32 %v1021_v8  ;;  %v1024_v32 = vmax.f32 %v944_v46, 1e-24 }
 0x2ca   :  { %v941_v57 = vpop.xlane.xlu0 %940 }
 0x2cb   :  { %1511 = vrsqrt.f32 %v1024_v32  ;;  %v1023_v9 = vmax.f32 %v941_v57, 1e-24 }
 0x2cc   :  { %v1500_v33 = vpop.eup %1499  ;;  %v950_v16 = vpop.xlane.xlu1 %949 }
 0x2cd   :  { %v1082_v37 = vmul.f32 %v1500_v33, %v2106_v39  ;;  %1513 = vrsqrt.f32 %v1023_v9  ;;  %v1026_v59 = vmax.f32 %v950_v16, 1e-24 }
 0x2ce   :  { %v1502_v17 = vpop.eup %1501  ;;  %v947_v62 = vpop.xlane.xlu0 %946 }
 0x2cf   :  { %1114 = vst.msk [vmem:[%s2462_s5 + $0x8] sm:$0xff] %vm84_vm0, %v1082_v37  ;;  %v1081_v22 = vmul.f32 %v1502_v17, %v2109_v54  ;;  %1515 = vrsqrt.f32 %v1026_v59  ;;  %v1025_v49 = vmax.f32 %v947_v62, 1e-24 }
 0x2d0   :  { %v1504_v23 = vpop.eup %1503  ;;  %v956_v11 = vpop.xlane.xlu1 %955 }
 0x2d1   :  { %1113 = vst.msk [vmem:[%s2462_s5] sm:$0xff] %vm84_vm0, %v1081_v22  ;;  %v1084_v39 = vmul.f32 %v1504_v23, %v2114_v55  ;;  %1517 = vrsqrt.f32 %v1025_v49  ;;  %v1028_v18 = vmax.f32 %v956_v11, 1e-24 }
 0x2d2   :  { %v1506_v51 = vpop.eup %1505  ;;  %v953_v27 = vpop.xlane.xlu0 %952 }
 0x2d3   :  { %1116 = vst.msk [vmem:[%s2462_s5 + $0x18] sm:$0xff] %vm84_vm0, %v1084_v39  ;;  %v1083_v54 = vmul.f32 %v1506_v51, %v2120_v60  ;;  %1519 = vrsqrt.f32 %v1028_v18  ;;  %v1027_v36 = vmax.f32 %v953_v27, 1e-24 }
 0x2d4   :  { %v1508_v45 = vpop.eup %1507  ;;  %v962_v53 = vpop.xlane.xlu1 %961 }
 0x2d5   :  { %1115 = vst.msk [vmem:[%s2462_s5 + $0x10] sm:$0xff] %vm84_vm0, %v1083_v54  ;;  %v1086_v55 = vmul.f32 %v1508_v45, %v2126_v63  ;;  %1521 = vrsqrt.f32 %v1027_v36  ;;  %v1030_v29 = vmax.f32 %v962_v53, 1e-24 }
 0x2d6   :  { %v1510_v21 = vpop.eup %1509  ;;  %v959_v34 = vpop.xlane.xlu0 %958 }
 0x2d7   :  { %1118 = vst.msk [vmem:[%s2462_s5 + $0x28] sm:$0xff] %vm84_vm0, %v1086_v55  ;;  %v1085_v60 = vmul.f32 %v1510_v21, %v2132_v10  ;;  %1523 = vrsqrt.f32 %v1030_v29  ;;  %v1029_v38 = vmax.f32 %v959_v34, 1e-24 }
 0x2d8   :  { %v1512_v24 = vpop.eup %1511  ;;  %v968_v2 = vpop.xlane.xlu1 %967 }
 0x2d9   :  { %1117 = vst.msk [vmem:[%s2462_s5 + $0x20] sm:$0xff] %vm84_vm0, %v1085_v60  ;;  %v1088_v63 = vmul.f32 %v1512_v24, %v2138_v3  ;;  %1525 = vrsqrt.f32 %v1029_v38  ;;  %v1032_v6 = vmax.f32 %v968_v2, 1e-24 }
 0x2da   :  { %v1514_v12 = vpop.eup %1513  ;;  %v965_v40 = vpop.xlane.xlu0 %964 }
 0x2db   :  { %1120 = vst.msk [vmem:[%s2462_s5 + $0x38] sm:$0xff] %vm84_vm0, %v1088_v63  ;;  %v1087_v10 = vmul.f32 %v1514_v12, %v2144_v28  ;;  %1527 = vrsqrt.f32 %v1032_v6  ;;  %v1031_v30 = vmax.f32 %v965_v40, 1e-24 }
 0x2dc   :  { %v1516_v41 = vpop.eup %1515  ;;  %v974_v8 = vpop.xlane.xlu1 %973 }
 0x2dd   :  { %1119 = vst.msk [vmem:[%s2462_s5 + $0x30] sm:$0xff] %vm84_vm0, %v1087_v10  ;;  %v1090_v3 = vmul.f32 %v1516_v41, %v2150_v44  ;;  %1529 = vrsqrt.f32 %v1031_v30  ;;  %v1034_v46 = vmax.f32 %v974_v8, 1e-24 }
 0x2de   :  { %v1518_v32 = vpop.eup %1517  ;;  %v971_v57 = vpop.xlane.xlu0 %970 }
 0x2df   :  { %1122 = vst.msk [vmem:[%s2462_s5 + $0x48] sm:$0xff] %vm84_vm0, %v1090_v3  ;;  %v1089_v28 = vmul.f32 %v1518_v32, %v2156_v4  ;;  %1531 = vrsqrt.f32 %v1034_v46  ;;  %v1033_v9 = vmax.f32 %v971_v57, 1e-24 }
 0x2e0   :  { %v1520_v33 = vpop.eup %1519  ;;  %v980_v16 = vpop.xlane.xlu1 %979 }
 0x2e1   :  { %1121 = vst.msk [vmem:[%s2462_s5 + $0x40] sm:$0xff] %vm84_vm0, %v1089_v28  ;;  %v1092_v44 = vmul.f32 %v1520_v33, %v2162_v1  ;;  %1533 = vrsqrt.f32 %v1033_v9  ;;  %v1036_v37 = vmax.f32 %v980_v16, 1e-24 }
 0x2e2   :  { %v1522_v59 = vpop.eup %1521  ;;  %v977_v17 = vpop.xlane.xlu0 %976 }
 0x2e3   :  { %1124 = vst.msk [vmem:[%s2462_s5 + $0x58] sm:$0xff] %vm84_vm0, %v1092_v44  ;;  %v1091_v4 = vmul.f32 %v1522_v59, %v2168_v7  ;;  %1535 = vrsqrt.f32 %v1036_v37  ;;  %v1035_v62 = vmax.f32 %v977_v17, 1e-24 }
 0x2e4   :  { %v1524_v22 = vpop.eup %1523  ;;  %v986_v49 = vpop.xlane.xlu1 %985 }
 0x2e5   :  { %1123 = vst.msk [vmem:[%s2462_s5 + $0x50] sm:$0xff] %vm84_vm0, %v1091_v4  ;;  %v1094_v1 = vmul.f32 %v1524_v22, %v2174_v25  ;;  %1537 = vrsqrt.f32 %v1035_v62  ;;  %v1038_v23 = vmax.f32 %v986_v49, 1e-24 }
 0x2e6   :  { %v1526_v11 = vpop.eup %1525  ;;  %v983_v39 = vpop.xlane.xlu0 %982 }
 0x2e7   :  { %1126 = vst.msk [vmem:[%s2462_s5 + $0x68] sm:$0xff] %vm84_vm0, %v1094_v1  ;;  %v1093_v7 = vmul.f32 %v1526_v11, %v2180_v13  ;;  %1539 = vrsqrt.f32 %v1038_v23  ;;  %v1037_v18 = vmax.f32 %v983_v39, 1e-24 }
 0x2e8   :  { %v1528_v51 = vpop.eup %1527  ;;  %v992_v27 = vpop.xlane.xlu1 %991 }
 0x2e9   :  { %1125 = vst.msk [vmem:[%s2462_s5 + $0x60] sm:$0xff] %vm84_vm0, %v1093_v7  ;;  %v1096_v25 = vmul.f32 %v1528_v51, %v2186_v31  ;;  %1541 = vrsqrt.f32 %v1037_v18  ;;  %v1040_v54 = vmax.f32 %v992_v27, 1e-24 }
 0x2ea   :  { %v1530_v36 = vpop.eup %1529  ;;  %v989_v45 = vpop.xlane.xlu0 %988 }
 0x2eb   :  { %1128 = vst.msk [vmem:[%s2462_s5 + $0x78] sm:$0xff] %vm84_vm0, %v1096_v25  ;;  %v1095_v13 = vmul.f32 %v1530_v36, %v2192_v15  ;;  %1543 = vrsqrt.f32 %v1040_v54  ;;  %v1039_v53 = vmax.f32 %v989_v45, 1e-24 }
 0x2ec   :  { %v1532_v55 = vpop.eup %1531  ;;  %v998_v29 = vpop.xlane.xlu1 %997 }
 0x2ed   :  { %1127 = vst.msk [vmem:[%s2462_s5 + $0x70] sm:$0xff] %vm84_vm0, %v1095_v13  ;;  %v1098_v31 = vmul.f32 %v1532_v55, %v2198_v58  ;;  %1545 = vrsqrt.f32 %v1039_v53  ;;  %v1042_v21 = vmax.f32 %v998_v29, 1e-24 }
 0x2ee   :  { %v1534_v34 = vpop.eup %1533  ;;  %v995_v60 = vpop.xlane.xlu0 %994 }
 0x2ef   :  { %1130 = vst.msk [vmem:[%s2462_s5 + $0x88] sm:$0xff] %vm84_vm0, %v1098_v31  ;;  %v1097_v15 = vmul.f32 %v1534_v34, %v2204_v42  ;;  %1547 = vrsqrt.f32 %v1042_v21  ;;  %v1041_v38 = vmax.f32 %v995_v60, 1e-24 }
 0x2f0   :  { %v1536_v24 = vpop.eup %1535  ;;  %v1004_v2 = vpop.xlane.xlu1 %1003 }
 0x2f1   :  { %1129 = vst.msk [vmem:[%s2462_s5 + $0x80] sm:$0xff] %vm84_vm0, %v1097_v15  ;;  %v1100_v58 = vmul.f32 %v1536_v24, %v2210_v48  ;;  %1549 = vrsqrt.f32 %v1041_v38  ;;  %v1044_v63 = vmax.f32 %v1004_v2, 1e-24 }
 0x2f2   :  { %v1538_v6 = vpop.eup %1537  ;;  %v1001_v12 = vpop.xlane.xlu0 %1000 }
 0x2f3   :  { %1132 = vst.msk [vmem:[%s2462_s5 + $0x98] sm:$0xff] %vm84_vm0, %v1100_v58  ;;  %v1099_v42 = vmul.f32 %v1538_v6, %v2216_v50  ;;  %1551 = vrsqrt.f32 %v1044_v63  ;;  %v1043_v40 = vmax.f32 %v1001_v12, 1e-24 }
 0x2f4   :  { %v1540_v10 = vpop.eup %1539  ;;  %v1010_v30 = vpop.xlane.xlu1 %1009 }
 0x2f5   :  { %1131 = vst.msk [vmem:[%s2462_s5 + $0x90] sm:$0xff] %vm84_vm0, %v1099_v42  ;;  %v1102_v48 = vmul.f32 %v1540_v10, %v2222_v0  ;;  %1553 = vrsqrt.f32 %v1043_v40  ;;  %v1046_v41 = vmax.f32 %v1010_v30, 1e-24 }
 0x2f6   :  { %v1542_v8 = vpop.eup %1541  ;;  %v1007_v3 = vpop.xlane.xlu0 %1006 }
 0x2f7   :  { %1134 = vst.msk [vmem:[%s2462_s5 + $0xa8] sm:$0xff] %vm84_vm0, %v1102_v48  ;;  %v1101_v50 = vmul.f32 %v1542_v8, %v2228_v26  ;;  %1555 = vrsqrt.f32 %v1046_v41  ;;  %v1045_v46 = vmax.f32 %v1007_v3, 1e-24 }
 0x2f8   :  { %v1544_v32 = vpop.eup %1543  ;;  %v1016_v57 = vpop.xlane.xlu1 %1015 }
 0x2f9   :  { %1133 = vst.msk [vmem:[%s2462_s5 + $0xa0] sm:$0xff] %vm84_vm0, %v1101_v50  ;;  %v1104_v0 = vmul.f32 %v1544_v32, %v2234_v52  ;;  %1557 = vrsqrt.f32 %v1045_v46  ;;  %v1048_v28 = vmax.f32 %v1016_v57, 1e-24 }
 0x2fa   :  { %v1546_v9 = vpop.eup %1545  ;;  %v1013_v33 = vpop.xlane.xlu0 %1012 }
 0x2fb   :  { %1136 = vst.msk [vmem:[%s2462_s5 + $0xb8] sm:$0xff] %vm84_vm0, %v1104_v0  ;;  %v1103_v26 = vmul.f32 %v1546_v9, %v2240_v5  ;;  %1559 = vrsqrt.f32 %v1048_v28  ;;  %v1047_v16 = vmax.f32 %v1013_v33, 1e-24 }
 0x2fc   :  { %v1548_v44 = vpop.eup %1547 }
 0x2fd   :  { %1135 = vst.msk [vmem:[%s2462_s5 + $0xb0] sm:$0xff] %vm84_vm0, %v1103_v26  ;;  %v1106_v52 = vmul.f32 %v1548_v44, %v2246_v35  ;;  %1561 = vrsqrt.f32 %v1047_v16 }
 0x2fe   :  { %v1550_v37 = vpop.eup %1549 }
 0x2ff   :  { %1138 = vst.msk [vmem:[%s2462_s5 + $0xc8] sm:$0xff] %vm84_vm0, %v1106_v52  ;;  %v1105_v59 = vmul.f32 %v1550_v37, %v2252_v56 }
 0x300   :  { %v1552_v5 = vpop.eup %1551 }
 0x301   :  { %1137 = vst.msk [vmem:[%s2462_s5 + $0xc0] sm:$0xff] %vm84_vm0, %v1105_v59  ;;  %v1108_v17 = vmul.f32 %v1552_v5, %v2258_v14 }
 0x302   :  { %v1554_v4 = vpop.eup %1553 }
 0x303   :  { %1140 = vst.msk [vmem:[%s2462_s5 + $0xd8] sm:$0xff] %vm84_vm0, %v1108_v17  ;;  %v1107_v35 = vmul.f32 %v1554_v4, %v2264_v47 }
 0x304   :  { %v1556_v62 = vpop.eup %1555 }
 0x305   :  { %1139 = vst.msk [vmem:[%s2462_s5 + $0xd0] sm:$0xff] %vm84_vm0, %v1107_v35  ;;  %v1110_v56 = vmul.f32 %v1556_v62, %v2270_v20 }
 0x306   :  { %v1558_v22 = vpop.eup %1557 }
 0x307   :  { %1142 = vst.msk [vmem:[%s2462_s5 + $0xe8] sm:$0xff] %vm84_vm0, %v1110_v56  ;;  %v1109_v14 = vmul.f32 %v1558_v22, %v2276_v43 }
 0x308   :  { %v1560_v49 = vpop.eup %1559 }
 0x309   :  { %1141 = vst.msk [vmem:[%s2462_s5 + $0xe0] sm:$0xff] %vm84_vm0, %v1109_v14  ;;  %v1112_v47 = vmul.f32 %v1560_v49, %v2282_v61 }
 0x30a   :  { %v1562_v1 = vpop.eup %1561 }
 0x30b   :  { %1144 = vst.msk [vmem:[%s2462_s5 + $0xf8] sm:$0xff] %vm84_vm0, %v1112_v47  ;;  %v1111_v20 = vmul.f32 %v1562_v1, %v2288_v19 }
 0x30d   :  { %1143 = vst.msk [vmem:[%s2462_s5 + $0xf0] sm:$0xff] %vm84_vm0, %v1111_v20 }

</bundles_post_ra>
